<compile_context>
chip_gen: v7x
topology: tpu7x:2x2x1
jax: 0.10.0
libtpu: 0.0.40
codegen_flags: <defaults>
</compile_context>

<pallas_src>
import math
import numpy as np
import jax
import jax.numpy as jnp
from jax.experimental import pallas as pl
from jax.experimental.pallas import tpu as pltpu

NEG_SLOPE = 0.2   # nn.LeakyReLU(negative_slope=0.2)
LANE = 128        # pad output channels to a lane-dense multiple of 128
SUBLANE = 8       # f32 sublane height: pad batch rows to a multiple of 8
TB_MAX = 256      # batch tile when the parallel batch grid kicks in


# ----------------------------------------------------------------------------
# Skeleton topology helpers (pure Python glue, mirrors deep-motion-editing)
# ----------------------------------------------------------------------------
def calc_edge_mat(edges):
    n = len(edges)
    INF = 100000
    mat = [[INF] * n for _ in range(n)]
    for i in range(n):
        mat[i][i] = 0
    for i, a in enumerate(edges):
        for j, b in enumerate(edges):
            if a[0] in b or a[1] in b:
                mat[i][j] = 1
    for k in range(n):
        for i in range(n):
            for j in range(n):
                if mat[i][k] + mat[k][j] < mat[i][j]:
                    mat[i][j] = mat[i][k] + mat[k][j]
    return mat


def find_neighbor(edges, d):
    mat = calc_edge_mat(edges)
    n = len(mat)
    neighbor_list = []
    for i in range(n):
        neighbor_list.append([j for j in range(n) if mat[i][j] <= d])
    # global-part neighbor (reproduces original code, including known quirk)
    global_part_neighbor = list(neighbor_list[0])
    for i in global_part_neighbor:
        neighbor_list[i].append(n)
    neighbor_list.append(global_part_neighbor)
    return neighbor_list


def skeleton_pool_weight(edges, channels_per_edge):
    """Builds the SkeletonPool 'mean' matrix and the new (pooled) edge list."""
    edge_num = len(edges) + 1
    seq_list = []
    pooling_list = []
    new_edges = []
    degree = [0] * 100
    for e in edges:
        degree[e[0]] += 1
        degree[e[1]] += 1

    def find_seq(j, seq):
        if degree[j] > 2 and j != 0:
            seq_list.append(seq)
            seq = []
        if degree[j] == 1:
            seq_list.append(seq)
            return
        for idx, e in enumerate(edges):
            if e[0] == j:
                find_seq(e[1], seq + [idx])

    find_seq(0, [])
    for seq in seq_list:
        if len(seq) % 2 == 1:
            pooling_list.append([seq[0]])
            new_edges.append(edges[seq[0]])
            seq = seq[1:]
        for i in range(0, len(seq), 2):
            pooling_list.append([seq[i], seq[i + 1]])
            new_edges.append([edges[seq[i]][0], edges[seq[i + 1]][1]])
    pooling_list.append([edge_num - 1])  # global position channel

    weight = np.zeros((len(pooling_list) * channels_per_edge,
                       edge_num * channels_per_edge), dtype=np.float32)
    for i, pair in enumerate(pooling_list):
        for j in pair:
            for c in range(channels_per_edge):
                weight[i * channels_per_edge + c, j * channels_per_edge + c] = 1.0 / len(pair)
    return jnp.asarray(weight), new_edges


def skeleton_linear_params(key, neighbor_list, in_channels, out_channels):
    """Deterministic weight/mask/bias for SkeletonLinear (synthetic init)."""
    J = len(neighbor_list)
    in_per = in_channels // J
    out_per = out_channels // J
    mask = np.zeros((out_channels, in_channels), dtype=np.float32)
    for i, nb in enumerate(neighbor_list):
        cols = [k * in_per + c for k in nb for c in range(in_per)]
        mask[i * out_per:(i + 1) * out_per, cols] = 1.0
    kw, kb = jax.random.split(key)
    bound = 1.0 / math.sqrt(in_channels)
    w = jax.random.uniform(kw, (out_channels, in_channels),
                           minval=-bound, maxval=bound, dtype=jnp.float32)
    b = jax.random.uniform(kb, (out_channels,),
                           minval=-bound, maxval=bound, dtype=jnp.float32)
    return w, jnp.asarray(mask), b


# ----------------------------------------------------------------------------
# Build-time parameter fusion: mask + pool folded, transposed, lane-padded
# ----------------------------------------------------------------------------
def _round_up(n, m):
    return ((n + m - 1) // m) * m


def fuse_params(raw_layers, weight_dtype=jnp.float32):
    """Fold mask & pool into a single pre-transposed, lane-padded weight per layer.

    `weight_dtype=jnp.bfloat16` halves weight DMA bytes / VMEM residency and hits
    the native bf16 MXU path (recommended on v6e/v7x); activations and the f32
    accumulation are unchanged, but test tolerances must be loosened.
    """
    fused = []
    prev_pad = None   # padded width of previous layer's output
    prev_out = None   # actual width of previous layer's output
    for (w, m, b, p) in raw_layers:
        wm = w * m                       # (Cout, Cin) — mask folded once
        if p is not None:
            W = p @ wm                   # (Cp, Cin)  — pool folded (exact)
            bf = p @ b                   # (Cp,)
        else:
            W, bf = wm, b
        out_dim, in_dim = W.shape
        pad_out = _round_up(out_dim, LANE)

        Wt = W.T                                              # (Cin, Cout_eff)
        Wt = jnp.pad(Wt, ((0, 0), (0, pad_out - out_dim)))    # lane-dense out
        # NOTE: padded output lanes stay exactly 0 only because the padded bias
        # lanes are 0 AND LeakyReLU(0) == 0; if either changes, the zero-row
        # assumption feeding the next layer's padded Cin breaks.
        bf = jnp.pad(bf, (0, pad_out - out_dim)).reshape(1, pad_out)
        assert float(jnp.max(jnp.abs(bf[0, out_dim:]))) == 0.0 if pad_out > out_dim else True

        if prev_pad is not None:
            # Previous layer's padded output lanes are exactly 0, so zero weight
            # rows keep the math exact.
            assert in_dim == prev_out
            Wt = jnp.pad(Wt, ((0, prev_pad - in_dim), (0, 0)))

        fused.append(dict(w=Wt.astype(weight_dtype),
                          b=bf.astype(jnp.float32),
                          out_dim=out_dim, pad_dim=pad_out))
        prev_pad, prev_out = pad_out, out_dim
    return fused


def build_static_encoder(key, edges, num_layers, skeleton_dist,
                         weight_dtype=jnp.float32):
    raw_layers = []
    channels = 3
    for i in range(num_layers):
        neighbor_list = find_neighbor(edges, skeleton_dist)
        J = len(neighbor_list)
        in_ch = channels * J
        out_ch = channels * 2 * J
        key, sub = jax.random.split(key)
        w, m, b = skeleton_linear_params(sub, neighbor_list, in_ch, out_ch)
        pool_w = None
        if i < num_layers - 1:
            pool_w, edges = skeleton_pool_weight(edges, channels * 2)
        raw_layers.append((w, m, b, pool_w))
        channels *= 2
    return raw_layers, fuse_params(raw_layers, weight_dtype=weight_dtype)


# ----------------------------------------------------------------------------
# One fused Pallas kernel for the whole encoder
# ----------------------------------------------------------------------------
def make_fused_encoder_kernel(num_layers):
    def kernel(*refs):
        x_ref = refs[0]
        w_refs = refs[1:1 + num_layers]
        b_refs = refs[1 + num_layers:1 + 2 * num_layers]
        o_refs = refs[1 + 2 * num_layers:]
        cur = x_ref[...]                                  # (TB, Cin0), f32
        for i in range(num_layers):
            w = w_refs[i][...]                            # (Cin_pad, Cout_pad)
            # MXU matmul; cast only the matmul operand if weights are bf16,
            # keep bias add + activation in f32 (VPU path).
            h = jnp.dot(cur.astype(w.dtype), w,
                        preferred_element_type=jnp.float32) + b_refs[i][...]
            # LeakyReLU(0.2): max(h, 0.2*h) — exact for 0 < slope < 1.
            cur = jnp.maximum(h, NEG_SLOPE * h)
            o_refs[i][...] = cur                          # lane-dense store
    return kernel


def static_encoder_forward(fused_params, x):
    """Fused forward pass.

    Returns (padded_outs, out_dims, batch): lane/sublane-padded (B_pad, C_pad)
    layer outputs plus metadata. No per-output slicing is done here (each slice
    would be a separate tiny XLA copy + dispatch); consumers slice lazily or use
    `trim_static_encoder_outputs` to recover exact PyTorch-shaped outputs.
    """
    B = x.shape[0]
    x_flat = x.reshape(B, -1).astype(jnp.float32)         # (B, J*3)
    cin0 = x_flat.shape[1]
    num_layers = len(fused_params)
    ws = [p["w"] for p in fused_params]
    bs = [p["b"] for p in fused_params]
    out_dims = [p["out_dim"] for p in fused_params]
    pad_dims = [p["pad_dim"] for p in fused_params]

    # Sublane-pad the batch so every load/store is an unmasked full-vreg op.
    if B <= TB_MAX:
        tb = _round_up(max(B, 1), SUBLANE)
        B_pad = tb
        use_grid = False
    else:
        tb = TB_MAX
        B_pad = _round_up(B, tb)
        use_grid = True
    if B_pad != B:
        x_flat = jnp.pad(x_flat, ((0, B_pad - B), (0, 0)))

    flops = 2 * B_pad * sum(w.shape[0] * w.shape[1] for w in ws)
    bytes_accessed = (x_flat.size * x_flat.dtype.itemsize
                      + sum(w.size * w.dtype.itemsize for w in ws)
                      + sum(b.size * b.dtype.itemsize for b in bs)
                      + sum(B_pad * pd * 4 for pd in pad_dims))
    cost = pl.CostEstimate(flops=flops, transcendentals=0,
                           bytes_accessed=bytes_accessed)

    out_shape = tuple(jax.ShapeDtypeStruct((B_pad, pd), jnp.float32)
                      for pd in pad_dims)
    kernel = make_fused_encoder_kernel(num_layers)

    if not use_grid:
        # Small batch: single grid-less call, everything VMEM-resident.
        vmem = pl.BlockSpec(memory_space=pltpu.MemorySpace.VMEM)
        padded_outs = pl.pallas_call(
            kernel,
            out_shape=out_shape,
            in_specs=[vmem] * (1 + 2 * num_layers),
            out_specs=tuple(vmem for _ in pad_dims),
            cost_estimate=cost,
        )(x_flat, *ws, *bs)
    else:
        # Large batch: parallel grid over row tiles (megacore / v7x dual-TC
        # sharding). Weights/biases use constant index_maps -> fetched once and
        # kept VMEM-resident across the whole batch.
        x_spec = pl.BlockSpec((tb, cin0), lambda i: (i, 0))
        w_specs = [pl.BlockSpec(w.shape, lambda i: (0, 0)) for w in ws]
        b_specs = [pl.BlockSpec(b.shape, lambda i: (0, 0)) for b in bs]
        o_specs = tuple(pl.BlockSpec((tb, pd), lambda i: (i, 0)) for pd in pad_dims)

        weight_bytes = (sum(w.size * w.dtype.itemsize for w in ws)
                        + sum(b.size * b.dtype.itemsize for b in bs))
        # double-buffered in/out row tiles + resident weights, with margin
        tile_bytes = 2 * tb * cin0 * 4 + sum(2 * tb * pd * 4 for pd in pad_dims)
        needed = weight_bytes + tile_bytes
        # Explicit limit sized for v7x (64 MiB physical VMEM per TC).
        vmem_limit = int(min(max(needed * 3 // 2, 32 << 20), 64 << 20))

        padded_outs = pl.pallas_call(
            kernel,
            out_shape=out_shape,
            grid=(B_pad // tb,),
            in_specs=[x_spec, *w_specs, *b_specs],
            out_specs=o_specs,
            compiler_params=pltpu.CompilerParams(
                dimension_semantics=("parallel",),
                vmem_limit_bytes=vmem_limit),
            cost_estimate=cost,
        )(x_flat, *ws, *bs)

    return list(padded_outs), out_dims, B


def trim_static_encoder_outputs(x, padded_outs, out_dims, batch):
    """Recover exact PyTorch StaticEncoder.forward semantics: [x, l1, l2, ...]."""
    outs = [x]
    for o, d in zip(padded_outs, out_dims):
        outs.append(o[:batch, :d])
    return outs


# ----------------------------------------------------------------------------
# Pure-JAX reference (uses the raw, un-fused parameters)
# ----------------------------------------------------------------------------
def static_encoder_ref(raw_layers, x):
    outputs = [x]
    cur = x.reshape(x.shape[0], -1)
    for (w, m, b, p) in raw_layers:
        h = cur @ (w * m).T + b
        if p is not None:
            h = h @ p.T
        cur = jnp.where(h >= 0, h, NEG_SLOPE * h)
        outputs.append(cur)
    return outputs


if __name__ == "__main__":
    # Small binary-tree skeleton: 7 joints, 6 edges, root (0) has two chains.
    edges = [[0, 1], [1, 2], [2, 3], [0, 4], [4, 5], [5, 6]]
    num_layers = 2
    skeleton_dist = 2

    key = jax.random.PRNGKey(0)
    key, pkey, xkey1, xkey2 = jax.random.split(key, 4)
    # weight_dtype=jnp.bfloat16 is the recommended setting on v6e/v7x; keep f32
    # here so the reference comparison stays at 1e-5 tolerance.
    raw_layers, fused_params = build_static_encoder(pkey, edges, num_layers,
                                                    skeleton_dist,
                                                    weight_dtype=jnp.float32)
    J = len(edges) + 1

    # --- small batch: grid-less, fully VMEM-resident path -------------------
    B = 2
    x = jax.random.normal(xkey1, (B, J, 3), dtype=jnp.float32)  # (batch, joints, xyz)
    padded_outs, out_dims, b = static_encoder_forward(fused_params, x)
    jax.block_until_ready(padded_outs)
    outs = trim_static_encoder_outputs(x, padded_outs, out_dims, b)
    refs = static_encoder_ref(raw_layers, x)
    for o, r in zip(outs, refs):
        assert o.shape == r.shape, (o.shape, r.shape)
        np.testing.assert_allclose(np.asarray(o), np.asarray(r), rtol=1e-5, atol=1e-5)

    # --- large batch: parallel batch-grid path (megacore/v7x dual-TC) -------
    B = 384
    x = jax.random.normal(xkey2, (B, J, 3), dtype=jnp.float32)
    padded_outs, out_dims, b = static_encoder_forward(fused_params, x)
    jax.block_until_ready(padded_outs)
    outs = trim_static_encoder_outputs(x, padded_outs, out_dims, b)
    refs = static_encoder_ref(raw_layers, x)
    for o, r in zip(outs, refs):
        assert o.shape == r.shape, (o.shape, r.shape)
        np.testing.assert_allclose(np.asarray(o), np.asarray(r), rtol=1e-5, atol=1e-5)

    print("KERNEL_OK")
</pallas_src>

<mosaic_0001>
module attributes {stable_mosaic.version = 11 : i64} {
  func.func @kernel(%arg0: memref<8x21xf32, #tpu.memory_space<vmem>>, %arg1: memref<21x128xf32, #tpu.memory_space<vmem>>, %arg2: memref<128x128xf32, #tpu.memory_space<vmem>>, %arg3: memref<1x128xf32, #tpu.memory_space<vmem>>, %arg4: memref<1x128xf32, #tpu.memory_space<vmem>>, %arg5: memref<8x128xf32, #tpu.memory_space<vmem>>, %arg6: memref<8x128xf32, #tpu.memory_space<vmem>>) attributes {dimension_semantics = [], scalar_prefetch = 0 : i64, scratch_operands = 0 : i64, tpu.core_type = #tpu.core_type<tc>} {
    %c0 = arith.constant 0 : index
    %c0_0 = arith.constant 0 : index
    %0 = vector.load %arg0[%c0, %c0_0] : memref<8x21xf32, #tpu.memory_space<vmem>>, vector<8x21xf32>
    %c0_1 = arith.constant 0 : index
    %c0_2 = arith.constant 0 : index
    %1 = vector.load %arg1[%c0_1, %c0_2] : memref<21x128xf32, #tpu.memory_space<vmem>>, vector<21x128xf32>
    %cst = arith.constant dense<0.000000e+00> : vector<8x128xf32>
    %2 = tpu.matmul %0, %1, %cst {dimension_numbers = #tpu.dot_dimension_numbers<[1], [0], [0], [1], [0, 0, 1, 1], [], []>} : vector<8x21xf32>, vector<21x128xf32>, vector<8x128xf32> -> vector<8x128xf32>
    %c0_3 = arith.constant 0 : index
    %c0_4 = arith.constant 0 : index
    %3 = vector.load %arg3[%c0_3, %c0_4] : memref<1x128xf32, #tpu.memory_space<vmem>>, vector<1x128xf32>
    %4 = vector.broadcast %3 : vector<1x128xf32> to vector<8x128xf32>
    %5 = arith.addf %2, %4 : vector<8x128xf32>
    %cst_5 = arith.constant 2.000000e-01 : f32
    %6 = vector.broadcast %cst_5 : f32 to vector<8x128xf32>
    %7 = arith.mulf %6, %5 : vector<8x128xf32>
    %8 = arith.maximumf %5, %7 : vector<8x128xf32>
    %c0_6 = arith.constant 0 : index
    %c0_7 = arith.constant 0 : index
    %9 = vector.load %arg5[%c0_6, %c0_7] : memref<8x128xf32, #tpu.memory_space<vmem>>, vector<8x128xf32>
    tpu.vector_store %arg5[%c0_6, %c0_7], %8 {strides = array<i32>} : memref<8x128xf32, #tpu.memory_space<vmem>>, vector<8x128xf32>,
    %c0_8 = arith.constant 0 : index
    %c0_9 = arith.constant 0 : index
    %10 = vector.load %arg2[%c0_8, %c0_9] : memref<128x128xf32, #tpu.memory_space<vmem>>, vector<128x128xf32>
    %cst_10 = arith.constant dense<0.000000e+00> : vector<8x128xf32>
    %11 = tpu.matmul %8, %10, %cst_10 {dimension_numbers = #tpu.dot_dimension_numbers<[1], [0], [0], [1], [0, 0, 1, 1], [], []>} : vector<8x128xf32>, vector<128x128xf32>, vector<8x128xf32> -> vector<8x128xf32>
    %c0_11 = arith.constant 0 : index
    %c0_12 = arith.constant 0 : index
    %12 = vector.load %arg4[%c0_11, %c0_12] : memref<1x128xf32, #tpu.memory_space<vmem>>, vector<1x128xf32>
    %13 = vector.broadcast %12 : vector<1x128xf32> to vector<8x128xf32>
    %14 = arith.addf %11, %13 : vector<8x128xf32>
    %cst_13 = arith.constant 2.000000e-01 : f32
    %15 = vector.broadcast %cst_13 : f32 to vector<8x128xf32>
    %16 = arith.mulf %15, %14 : vector<8x128xf32>
    %17 = arith.maximumf %14, %16 : vector<8x128xf32>
    %c0_14 = arith.constant 0 : index
    %c0_15 = arith.constant 0 : index
    %18 = vector.load %arg6[%c0_14, %c0_15] : memref<8x128xf32, #tpu.memory_space<vmem>>, vector<8x128xf32>
    tpu.vector_store %arg6[%c0_14, %c0_15], %17 {strides = array<i32>} : memref<8x128xf32, #tpu.memory_space<vmem>>, vector<8x128xf32>,
    return
  }
}

</mosaic_0001>

<bundles_post_ra>
// kernel: tpu_custom_call.1
= control target key start
LH: loop header
LB: loop body
LE: loop exit
PB: predicated region body
PF: predicated region fallthrough
CT: control target
= control target key end

     0   :  { %12 = vsyncpa [#allocation3], 0  ;;  %s622_s0 = inlined_call_operand.hbm [shape: f32[8,21], index: 0, kind: input, shape index: {}]   ;;  %s623_s1 = inlined_call_operand.hbm [shape: f32[21,128], index: 1, kind: input, shape index: {}]   ;;  %s624_s2 = inlined_call_operand.hbm [shape: f32[128,128], index: 2, kind: input, shape index: {}]   ;;  %s625_s3 = inlined_call_operand.vmem [shape: f32[1,128], index: 3, kind: input, shape index: {}]   ;;  %s626_s4 = inlined_call_operand.vmem [shape: f32[1,128], index: 4, kind: input, shape index: {}]   ;;  %s627_s5 = inlined_call_operand.hbm [shape: f32[8,128], index: 5, kind: output, shape index: {0}]   ;;  %s628_s6 = inlined_call_operand.hbm [shape: f32[8,128], index: 6, kind: output, shape index: {1}]  }
   0x1   :  { %13 = vsyncpa [#allocation6], 0 }
   0x2   :  { %14 = vsyncpa [#allocation4], 0 }
   0x3   :  { %15 = vsyncpa [#allocation10], 0  ;;  %s505_s21 = smov [#allocation5]   ;;  %s387_s25 = scalar_lea.hbm %s623_s1, 384 }
   0x4   :  { %s31_s22 = sshll.u32 %s505_s21, 4  ;;  %p388_p0 = scmp.ne.s32.totalorder %s623_s1, %s387_s25  ;;  %s32_s22 = int_to_ptr.vmem [resolvable:$true] %s31_s22 }
   0x5   :  { %p391_p1 = scmp.lt.u32.totalorder %s387_s25, %s623_s1 }
   0x7   :  { %p393_p2 = pnand %p391_p1, %p388_p0 }
   0x9   :  { %396 = shalt.err (!%p393_p2)
}
   0xa   :  { %s397_s30 = scalar_lea.vmem %s32_s22, 384  ;;  %p402_p4 = scmp.lt.s32.totalorder %s32_s22, %s32_s22 }
   0xb   :  { %p398_p3 = scmp.ne.s32.totalorder %s32_s22, %s397_s30  ;;  %p403_p5 = scmp.lt.s32.totalorder %s397_s30, %s397_s30 }
   0xd   :  { %p404_p6 = por %p403_p5, %p402_p4 }
   0xf   :  { %p405_p7 = pnand %p404_p6, %p398_p3 }
  0x11   :  { %408 = shalt.err (!%p405_p7)
}
  0x12   :  { %s506_s7 = smov 128   ;;  %s507_s8 = smov 8  }
  0x13   :  { %37 = dma.hbm_to_vmem [thread:$0]  %s623_s1, 384, %s32_s22, [#allocation6], %s506_s7, %s506_s7, %s507_s8  }
  0x14   :  { %s508_s11 = smov [#allocation2]   ;;  %s509_s13 = smov [#allocation7]  }
  0x15   :  { %s22_s12 = sshll.u32 %s508_s11, 4  ;;  %s43_s14 = sshll.u32 %s509_s13, 4  ;;  %s23_s12 = int_to_ptr.vmem [resolvable:$true] %s22_s12  ;;  %s44_s14 = int_to_ptr.vmem [resolvable:$true] %s43_s14 }
  0x16   :  { %s409_s17 = scalar_lea.hbm %s622_s0, 128 }
  0x17   :  { %p410_p8 = scmp.ne.s32.totalorder %s622_s0, %s409_s17  ;;  %p413_p9 = scmp.lt.u32.totalorder %s409_s17, %s622_s0 }
  0x19   :  { %p415_p10 = pnand %p413_p9, %p410_p8 }
  0x1b   :  { %418 = shalt.err (!%p415_p10)
}
  0x1c   :  { %s419_s1 = scalar_lea.vmem %s23_s12, 128  ;;  %p424_p12 = scmp.lt.s32.totalorder %s23_s12, %s23_s12 }
  0x1d   :  { %p420_p11 = scmp.ne.s32.totalorder %s23_s12, %s419_s1  ;;  %p425_p13 = scmp.lt.s32.totalorder %s419_s1, %s419_s1 }
  0x1f   :  { %p426_p0 = por %p425_p13, %p424_p12 }
  0x21   :  { %p427_p1 = pnand %p426_p0, %p420_p11 }
  0x23   :  { %430 = shalt.err (!%p427_p1)
}
  0x24   :  { %25 = dma.hbm_to_vmem [thread:$0]  %s622_s0, 128, %s23_s12, [#allocation3]  }
  0x25   :  { %s431_s26 = scalar_lea.hbm %s624_s2, 2048 }
  0x26   :  { %p432_p2 = scmp.ne.s32.totalorder %s624_s2, %s431_s26  ;;  %p435_p3 = scmp.lt.u32.totalorder %s431_s26, %s624_s2 }
  0x28   :  { %p437_p4 = pnand %p435_p3, %p432_p2 }
  0x2a   :  { %440 = shalt.err (!%p437_p4)
}
  0x2b   :  { %s441_s9 = scalar_lea.vmem %s44_s14, 2048  ;;  %p446_p6 = scmp.lt.s32.totalorder %s44_s14, %s44_s14 }
  0x2c   :  { %p442_p5 = scmp.ne.s32.totalorder %s44_s14, %s441_s9  ;;  %p447_p7 = scmp.lt.s32.totalorder %s441_s9, %s441_s9 }
  0x2e   :  { %p448_p8 = por %p447_p7, %p446_p6 }
  0x30   :  { %p449_p9 = pnand %p448_p8, %p442_p5 }
  0x32   :  { %452 = shalt.err (!%p449_p9)
}
  0x33   :  { %49 = dma.hbm_to_vmem [thread:$0]  %s624_s2, 2048, %s44_s14, [#allocation6], %s506_s7, %s506_s7, %s507_s8  }
  0x34   :  { %497 = dma.done.wait [#allocation3], 128  }
  0x35   :  { %498 = vsyncadd [#allocation3], 4294967168 }
  0x36   :  { %499 = dma.done.wait [#allocation6], 2432  }
  0x37   :  { %500 = vsyncadd [#allocation6], 4294964864  ;;  %v510_v0 = vmov 0.0|0.0   ;;  %vm511_vm0 = vmmov 0   ;;  %v512_v1 = vmov 0.0   ;;  %v64_v2 = vld [vmem:[#allocation5] sm:$0xff] }
  0x38   :  { %350 = vmatprep.subr.bf16.mxu0 %v510_v0  ;;  %312 = vmatprep.mubr.msk.f32.mxu0 %vm511_vm0, %v512_v1  ;;  %v65_v3 = vld [vmem:[#allocation5 + $0x8] sm:$0xff]  ;;  %v155_v5 = vld [vmem:[#allocation7] sm:$0xff]  ;;  %v156_v6 = vld [vmem:[#allocation7 + $0x8] sm:$0xff]  ;;  %vm78_vm1 = vcmask 1044480   ;;  %vm74_vm2 = vcmask 171008   ;;  %s513_s8 = smov [#allocation8]  }
  0x39   :  { %353 = vmatprep.subr.bf16.mxu1 %v510_v0  ;;  %347 = vmatprep.mubr.msk.f32.mxu1 %vm511_vm0, %v512_v1  ;;  %v351_v4 = vpack.c.bf16 %v65_v3, %v64_v2  ;;  %v354_v7 = vpack.c.bf16 %v156_v6, %v155_v5  ;;  %v157_v8 = vld [vmem:[#allocation7 + $0x10] sm:$0xff]  ;;  %v158_v9 = vld [vmem:[#allocation7 + $0x18] sm:$0xff]  ;;  %v63_v12 = vld [vmem:[#allocation2] sm:$0xff]  ;;  %s257_s11 = sshll.u32 %s513_s8, 4  ;;  %s258_s11 = int_to_ptr.vmem [resolvable:$true] %s257_s11 }
  0x3a   :  { %v66_v10 = vld [vmem:[#allocation5 + $0x10] sm:$0x1f]  ;;  %v357_v11 = vpack.c.bf16 %v158_v9, %v157_v8  ;;  %v159_v13 = vld [vmem:[#allocation7 + $0x20] sm:$0xff]  ;;  %v160_v14 = vld [vmem:[#allocation7 + $0x28] sm:$0xff]  ;;  %s453_s12 = scalar_lea.vmem %s258_s11, 128  ;;  %p458_p11 = scmp.lt.s32.totalorder %s258_s11, %s258_s11 }
  0x3b   :  { %352 = vmatpush3.bf16.msra.mxu0 %v351_v4  ;;  %355 = vmatpush3.bf16.msra.mxu1 %v354_v7  ;;  %v360_v15 = vpack.c.bf16 %v160_v14, %v159_v13  ;;  %v161_v16 = vld [vmem:[#allocation7 + $0x30] sm:$0xff]  ;;  %v162_v17 = vld [vmem:[#allocation7 + $0x38] sm:$0xff]  ;;  %v163_v19 = vld [vmem:[#allocation7 + $0x40] sm:$0xff]  ;;  %p454_p10 = scmp.ne.s32.totalorder %s258_s11, %s453_s12  ;;  %p459_p12 = scmp.lt.s32.totalorder %s453_s12, %s453_s12 }
  0x3c   :  { %310 = vmatprep.subr.mxu0 %v512_v1  ;;  %356 = vmatprep.subr.bf16.mxu1 %v510_v0  ;;  %v363_v18 = vpack.c.bf16 %v162_v17, %v161_v16  ;;  %v164_v20 = vld [vmem:[#allocation7 + $0x48] sm:$0xff]  ;;  %v165_v22 = vld [vmem:[#allocation7 + $0x50] sm:$0xff]  ;;  %v166_v23 = vld [vmem:[#allocation7 + $0x58] sm:$0xff] }
  0x3d   :  { %v366_v21 = vpack.c.bf16 %v164_v20, %v163_v19  ;;  %v369_v24 = vpack.c.bf16 %v166_v23, %v165_v22  ;;  %v167_v25 = vld [vmem:[#allocation7 + $0x60] sm:$0xff]  ;;  %v168_v26 = vld [vmem:[#allocation7 + $0x68] sm:$0xff]  ;;  %v169_v28 = vld [vmem:[#allocation7 + $0x70] sm:$0xff]  ;;  %p460_p13 = por %p459_p12, %p458_p11 }
  0x3e   :  { %v372_v27 = vpack.c.bf16 %v168_v26, %v167_v25  ;;  %v170_v29 = vld [vmem:[#allocation7 + $0x78] sm:$0xff]  ;;  %v281_v31 = vld [vmem:[%s625_s3] ss:$0 sm:$0xff] }
  0x3f   :  { %311 = vmatpush3.msk.msra.mxu0 %vm78_vm1, %v66_v10  ;;  %358 = vmatpush3.bf16.msra.mxu1 %v357_v11  ;;  %v375_v30 = vpack.c.bf16 %v170_v29, %v169_v28  ;;  %p461_p0 = pnand %p460_p13, %p454_p10 }
  0x40   :  { %313 = vmatmul.mubr.msk.f32.vlgmr.msra.gmra.mrb[0].mxu0 %vm74_vm2, %v63_v12  ;;  %359 = vmatprep.subr.bf16.mxu1 %v510_v0 }
  0x43   :  { %361 = vmatpush3.bf16.msra.mxu1 %v360_v15 }
  0x44   :  { %362 = vmatprep.subr.bf16.mxu1 %v510_v0 }
  0x47   :  { %364 = vmatpush3.bf16.msra.mxu1 %v363_v18 }
  0x48   :  { %365 = vmatprep.subr.bf16.mxu1 %v510_v0 }
  0x4b   :  { %367 = vmatpush3.bf16.msra.mxu1 %v366_v21 }
  0x4c   :  { %368 = vmatprep.subr.bf16.mxu1 %v510_v0 }
  0x4f   :  { %370 = vmatpush3.bf16.msra.mxu1 %v369_v24 }
  0x50   :  { %371 = vmatprep.subr.bf16.mxu1 %v510_v0 }
  0x53   :  { %373 = vmatpush3.bf16.msra.mxu1 %v372_v27 }
  0x54   :  { %374 = vmatprep.subr.bf16.mxu1 %v510_v0 }
  0x57   :  { %376 = vmatpush3.bf16.msra.mxu1 %v375_v30 }
 0x113   :  { %v148_v32 = vpop.f32.mrb[0].mxu0 }
 0x114   :  { %v149_v33 = vadd.f32 %v281_v31, %v148_v32  ;;  %v314_v34 = vpop.f32.mrb[1].mxu0 }
 0x116   :  { %v152_v35 = vmul.f32 0.2, %v149_v33 }
 0x118   :  { %v153_v36 = vmax.f32 %v149_v33, %v152_v35 }
 0x11a   :  { %154 = vst [vmem:[#allocation8] sm:$0xff] %v153_v36  ;;  %348 = vmatmul.mubr.f32.vlgmr.msra.gmra.mrb[0].mxu1 %v153_v36 }
 0x11b   :  { %464 = shalt.err (!%p461_p0)
}
 0x11c   :  { %s465_s3 = scalar_lea.hbm %s627_s5, 128 }
 0x11d   :  { %p466_p1 = scmp.ne.s32.totalorder %s627_s5, %s465_s3  ;;  %p469_p2 = scmp.lt.u32.totalorder %s465_s3, %s627_s5 }
 0x11f   :  { %p471_p3 = pnand %p469_p2, %p466_p1 }
 0x121   :  { %474 = shalt.err (!%p471_p3)
}
 0x122   :  { %260 = dma.vmem_to_hbm [thread:$0]  %s258_s11, 128, %s627_s5, [#allocation4]   ;;  %v284_v37 = vld [vmem:[%s626_s4] ss:$0 sm:$0xff] }
 0x123   :  { %s514_s22 = smov [#allocation9]  }
 0x124   :  { %s267_s23 = sshll.u32 %s514_s22, 4  ;;  %s268_s23 = int_to_ptr.vmem [resolvable:$true] %s267_s23 }
 0x125   :  { %s475_s24 = scalar_lea.vmem %s268_s23, 128  ;;  %p480_p5 = scmp.lt.s32.totalorder %s268_s23, %s268_s23 }
 0x126   :  { %p476_p4 = scmp.ne.s32.totalorder %s268_s23, %s475_s24  ;;  %p481_p6 = scmp.lt.s32.totalorder %s475_s24, %s475_s24 }
 0x128   :  { %p482_p7 = por %p481_p6, %p480_p5 }
 0x12a   :  { %p483_p8 = pnand %p482_p7, %p476_p4 }
 0x1ed   :  { %v244_v38 = vpop.f32.mrb[0].mxu1 }
 0x1ee   :  { %v245_v39 = vadd.f32 %v284_v37, %v244_v38  ;;  %v349_v40 = vpop.f32.mrb[1].mxu1 }
 0x1f0   :  { %v248_v41 = vmul.f32 0.2, %v245_v39 }
 0x1f2   :  { %v249_v42 = vmax.f32 %v245_v39, %v248_v41 }
 0x1f4   :  { %250 = vst [vmem:[#allocation9] sm:$0xff] %v249_v42 }
 0x1f5   :  { %486 = shalt.err (!%p483_p8)
}
 0x1f6   :  { %s487_s4 = scalar_lea.hbm %s628_s6, 128 }
 0x1f7   :  { %p488_p9 = scmp.ne.s32.totalorder %s628_s6, %s487_s4  ;;  %p491_p10 = scmp.lt.u32.totalorder %s487_s4, %s628_s6 }
 0x1f9   :  { %p493_p11 = pnand %p491_p10, %p488_p9 }
 0x1fb   :  { %496 = shalt.err (!%p493_p11)
}
 0x1fc   :  { %270 = dma.vmem_to_hbm [thread:$0]  %s268_s23, 128, %s628_s6, [#allocation10]  }
 0x1fd   :  { %501 = dma.done.wait [#allocation4], 128  }
 0x1fe   :  { %502 = vsyncadd [#allocation4], 4294967168 }
 0x1ff   :  { %503 = dma.done.wait [#allocation10], 128  }
 0x200   :  { %504 = vsyncadd [#allocation10], 4294967168 }
 0x201   :  { %277 = vsyncpa [#allocation3], 1 }
 0x202   :  { %278 = vsyncpa [#allocation6], 1 }
 0x203   :  { %279 = vsyncpa [#allocation4], 1 }
 0x204   :  { %280 = vsyncpa [#allocation10], 1 }

</bundles_post_ra>
